<compile_context>
chip_gen: v5e
topology: v5e:2x2
jax: 0.10.0
libtpu: 0.0.40
codegen_flags: <defaults>
</compile_context>

<pallas_src>
import functools

import jax
import jax.numpy as jnp
import numpy as np
from jax.experimental import pallas as pl
from jax.experimental.pallas import tpu as pltpu


# ConvTranspose2d(k=4, s=2, p=1): for output-row parity r, the contributing kernel
# rows kh and the corresponding input-row offsets dh (ih = oh // 2 + dh).
_CONVT_TAPS = {0: ((1, 0), (3, -1)), 1: ((0, 1), (2, 0))}

_SLAB_OFF = 128   # 128-aligned lane offset of each staged slab inside its region


# ---------------------------------------------------------------------------
# Fused kernel: LeakyReLU -> Conv2d(4,2,1) -> ReLU -> ConvT2d(4,2,1) -> BN -> concat
# Grid = (N,), "arbitrary"; the full output stays resident in VMEM across the batch.
# ---------------------------------------------------------------------------
def _unet_fused_kernel(x_ref, wd_ref, wu_ref, g_ref, b_ref,          # inputs
                       o_ref,                                        # output (resident)
                       stage_dn_ref, stage_up_ref, ssum_ref, ssq_ref,  # scratch
                       *, wh):
    n = pl.program_id(0)
    nprog = pl.num_programs(0)
    m = x_ref.shape[2] // 4              # flattened spatial size of one phase grid
    cin = x_ref.shape[1]
    cpad = stage_dn_ref.shape[0]         # cin rounded up to a sublane multiple
    ipad = stage_up_ref.shape[0]         # inner_nc rounded up to a sublane multiple
    inner = wd_ref.shape[0]
    outer = wu_ref.shape[1]
    region = stage_dn_ref.shape[1] // 4  # lanes per phase staging region

    # ---- one-time init: zero the staging halos + BN accumulators ----------------
    @pl.when(n == 0)
    def _init():
        stage_dn_ref[...] = jnp.zeros_like(stage_dn_ref)
        stage_up_ref[...] = jnp.zeros_like(stage_up_ref)
        ssum_ref[...] = jnp.zeros_like(ssum_ref)
        ssq_ref[...] = jnp.zeros_like(ssq_ref)

    # skip connection: lane-dense (cin, 4m) store of the untouched input
    o_ref[n, 0:cin, :] = x_ref[0]

    # Column-boundary masks for the +-1 lane shifts (row shifts and image edges are
    # handled by the zero halo around each staged slab).
    col = jax.lax.broadcasted_iota(jnp.int32, (1, m), 1) % wh
    col_ok = {-1: col > 0, 0: None, 1: col < wh - 1}

    def window(ref, base, rows, dh, dw):
        # value[:, u*wh + v] = staged[:, base + (u+dh)*wh + (v+dw)], zero outside.
        start = base + dh * wh + dw
        v = ref[0:rows, start:start + m]
        if col_ok[dw] is not None:
            v = jnp.where(col_ok[dw], v, 0.0)
        return v

    # ---- down path: LeakyReLU(0.2) -> Conv2d(4x4, s2, p1) as ONE stacked matmul --
    # Stage the 4 LeakyReLU'd input phases, each in its own zero-haloed region
    # (slab at a 128-aligned offset; LeakyReLU is applied exactly once per element).
    for a in range(2):
        for b in range(2):
            p = 2 * a + b
            ph = x_ref[0, :, p * m:(p + 1) * m]
            base = p * region + _SLAB_OFF
            stage_dn_ref[0:cin, base:base + m] = jnp.where(ph >= 0.0, ph, 0.2 * ph)

    # im2col: tap (kh, kw) of the strided conv reads input phase (a, b) shifted by
    # (dh, dw):  a = (kh+1) % 2,  dh = (kh-1)//2  (same for kw).  All 16 taps are
    # stacked along K (sublane-aligned 8-row pieces -> cheap concat), matching the
    # pre-stacked lane-dense weight matrix wd_ref of shape (inner, 16*cpad).
    parts = []
    for kh in range(4):
        a, dh = (kh + 1) % 2, (kh - 1) // 2
        for kw in range(4):
            b, dw = (kw + 1) % 2, (kw - 1) // 2
            base = (2 * a + b) * region + _SLAB_OFF
            parts.append(window(stage_dn_ref, base, cpad, dh, dw))
    im = jnp.concatenate(parts, axis=0)                          # (16*cpad, m)
    y1 = jnp.maximum(
        jnp.dot(wd_ref[...], im, preferred_element_type=jnp.float32), 0.0)  # uprelu

    # ---- up path: ConvTranspose2d(4x4, s2, p1), output-phase decomposition -------
    stage_up_ref[0:inner, _SLAB_OFF:_SLAB_OFF + m] = y1
    ywin = {(dh, dw): window(stage_up_ref, _SLAB_OFF, ipad, dh, dw)
            for dh in (-1, 0, 1) for dw in (-1, 0, 1)}

    for r in range(2):
        for s in range(2):
            stack = jnp.concatenate(
                [ywin[(dh, dw)]
                 for _, dh in _CONVT_TAPS[r] for _, dw in _CONVT_TAPS[s]],
                axis=0)                                          # (4*ipad, m)
            zp = jnp.dot(wu_ref[2 * r + s], stack,
                         preferred_element_type=jnp.float32)     # (outer, m)
            # un-normalized result parked in the resident output buffer (VMEM)
            o_ref[n, cin:cin + outer, (2 * r + s) * m:(2 * r + s + 1) * m] = zp
            ssum_ref[...] += zp
            ssq_ref[...] += zp * zp

    # ---- epilogue: finalize BatchNorm once, normalize the up half in place -------
    @pl.when(n == nprog - 1)
    def _finalize():
        count = o_ref.shape[0] * x_ref.shape[2]                  # N * H * W
        ssum = jnp.sum(ssum_ref[...], axis=1, keepdims=True)     # (outer, 1)
        ssq = jnp.sum(ssq_ref[...], axis=1, keepdims=True)
        mean = ssum / count
        var = ssq / count - mean * mean                          # biased (train-mode BN)
        scale = g_ref[...] * jax.lax.rsqrt(var + 1e-5)
        shift = b_ref[...] - mean * scale
        for i in range(o_ref.shape[0]):                          # static, small N
            o_ref[i, cin:cin + outer, :] = (
                o_ref[i, cin:cin + outer, :] * scale + shift)


# ---------------------------------------------------------------------------
# Forward pass of UnetSkipConnectionBlock (innermost=True, norm=BatchNorm2d)
# ---------------------------------------------------------------------------
def unet_innermost_forward(x, w_down, w_up, gamma, beta):
    N, cin, H, W = x.shape
    inner_nc = w_down.shape[0]
    outer_nc = w_up.shape[1]
    hh, wh = H // 2, W // 2
    m = hh * wh
    cpad = -(-cin // 8) * 8
    ipad = -(-inner_nc // 8) * 8
    C = cin + outer_nc
    assert wh + 1 <= _SLAB_OFF
    region = _SLAB_OFF + (-(-(m + wh + 1) // 128)) * 128   # per-phase staging width

    # ---- layout plumbing (small permutations only; all heavy work is in-kernel) --
    # phase-split, channel-major, spatially-flattened input:
    #   xph[n, c, (2*(h%2) + w%2)*m + (h//2)*wh + (w//2)] = x[n, c, h, w]
    xph = (x.astype(jnp.float32)
             .reshape(N, cin, hh, 2, wh, 2)
             .transpose(0, 1, 3, 5, 2, 4)
             .reshape(N, cin, 4 * m))

    # down-conv weights, tap-stacked along K, zero-padded to a sublane multiple:
    #   wd_mat[o, (kh*4+kw)*cpad + c] = w_down[o, c, kh, kw]
    wd_mat = jnp.zeros((inner_nc, 4, 4, cpad), jnp.float32)
    wd_mat = wd_mat.at[:, :, :, :cin].set(
        w_down.astype(jnp.float32).transpose(0, 2, 3, 1))
    wd_mat = wd_mat.reshape(inner_nc, 16 * cpad)

    # transposed-conv weights stacked per output phase:
    #   wu_stack[2r+s][o, t*ipad + c] = w_up[c, o, kh_t, kw_t]
    wu_blocks = []
    for r in range(2):
        for s in range(2):
            taps = []
            for kh, _ in _CONVT_TAPS[r]:
                for kw, _ in _CONVT_TAPS[s]:
                    blk = jnp.zeros((outer_nc, ipad), jnp.float32)
                    blk = blk.at[:, :inner_nc].set(
                        w_up[:, :, kh, kw].astype(jnp.float32).T)
                    taps.append(blk)
            wu_blocks.append(jnp.concatenate(taps, axis=1))
    wu_stack = jnp.stack(wu_blocks, axis=0)                  # (4, outer, 4*ipad)

    flops = N * (2 * inner_nc * 16 * cpad * m + 2 * 4 * outer_nc * 4 * ipad * m)
    bytes_accessed = 4 * (xph.size + wd_mat.size + wu_stack.size
                          + 2 * outer_nc + N * C * 4 * m)

    out_ph = pl.pallas_call(
        functools.partial(_unet_fused_kernel, wh=wh),
        grid=(N,),
        in_specs=[
            pl.BlockSpec((1, cin, 4 * m), lambda n: (n, 0, 0)),
            pl.BlockSpec((inner_nc, 16 * cpad), lambda n: (0, 0)),
            pl.BlockSpec((4, outer_nc, 4 * ipad), lambda n: (0, 0, 0)),
            pl.BlockSpec((outer_nc, 1), lambda n: (0, 0)),
            pl.BlockSpec((outer_nc, 1), lambda n: (0, 0)),
        ],
        # full output resident in VMEM across the batch grid; written back once
        out_specs=pl.BlockSpec((N, C, 4 * m), lambda n: (0, 0, 0)),
        out_shape=jax.ShapeDtypeStruct((N, C, 4 * m), jnp.float32),
        scratch_shapes=[
            pltpu.VMEM((cpad, 4 * region), jnp.float32),   # haloed down staging
            pltpu.VMEM((ipad, region), jnp.float32),       # haloed up staging
            pltpu.VMEM((outer_nc, m), jnp.float32),        # BN sum accumulator
            pltpu.VMEM((outer_nc, m), jnp.float32),        # BN sum-of-squares acc
        ],
        compiler_params=pltpu.CompilerParams(
            dimension_semantics=("arbitrary",)),
        cost_estimate=pl.CostEstimate(flops=flops, transcendentals=outer_nc,
                                      bytes_accessed=bytes_accessed),
    )(xph, wd_mat, wu_stack,
      gamma.astype(jnp.float32).reshape(-1, 1),
      beta.astype(jnp.float32).reshape(-1, 1))

    # Back to NCHW exactly once, at the API boundary.
    return (out_ph.reshape(N, C, 2, 2, hh, wh)
                  .transpose(0, 1, 4, 2, 5, 3)
                  .reshape(N, C, H, W))


# ---------------------------------------------------------------------------
# Pure-JAX reference (for correctness check only)
# ---------------------------------------------------------------------------
def _reference(x, w_down, w_up, gamma, beta):
    h = jnp.where(x >= 0, x, 0.2 * x)
    h = jax.lax.conv_general_dilated(
        h, w_down, window_strides=(2, 2), padding=((1, 1), (1, 1)),
        dimension_numbers=('NCHW', 'OIHW', 'NCHW'))
    h = jnp.maximum(h, 0.0)
    wf = jnp.flip(w_up, axis=(2, 3)).transpose(1, 0, 2, 3)
    h = jax.lax.conv_general_dilated(
        h, wf, window_strides=(1, 1), padding=((2, 2), (2, 2)),
        lhs_dilation=(2, 2), dimension_numbers=('NCHW', 'OIHW', 'NCHW'))
    mean = h.mean(axis=(0, 2, 3), keepdims=True)
    var = h.var(axis=(0, 2, 3), keepdims=True)
    h = (h - mean) * jax.lax.rsqrt(var + 1e-5)
    h = h * gamma.reshape(1, -1, 1, 1) + beta.reshape(1, -1, 1, 1)
    return jnp.concatenate([x, h], axis=1)


if __name__ == "__main__":
    # Module config: innermost block, outer_nc=4, inner_nc=8, input_nc=None -> 4,
    # norm_layer=BatchNorm2d (=> convs have no bias).
    outer_nc, inner_nc = 4, 8
    N, H, W = 2, 16, 16

    key = jax.random.PRNGKey(0)
    kx, kd, ku, kg, kb = jax.random.split(key, 5)
    x = jax.random.normal(kx, (N, outer_nc, H, W), dtype=jnp.float32)
    # Conv2d(input_nc=4, inner_nc=8, k=4) weight: (out, in, kh, kw)
    w_down = 0.1 * jax.random.normal(kd, (inner_nc, outer_nc, 4, 4), dtype=jnp.float32)
    # ConvTranspose2d(inner_nc=8, outer_nc=4, k=4) weight: (in, out, kh, kw)
    w_up = 0.1 * jax.random.normal(ku, (inner_nc, outer_nc, 4, 4), dtype=jnp.float32)
    # BatchNorm2d(outer_nc) affine params
    gamma = 1.0 + 0.1 * jax.random.normal(kg, (outer_nc,), dtype=jnp.float32)
    beta = 0.1 * jax.random.normal(kb, (outer_nc,), dtype=jnp.float32)

    out = jax.jit(unet_innermost_forward)(x, w_down, w_up, gamma, beta)
    out = jax.block_until_ready(out)

    ref = _reference(x, w_down, w_up, gamma, beta)
    assert out.shape == (N, 2 * outer_nc, H, W), out.shape
    np.testing.assert_allclose(np.asarray(out), np.asarray(ref), rtol=1e-4, atol=1e-4)

    print("KERNEL_OK")
</pallas_src>

<mosaic_0001>
module attributes {stable_mosaic.version = 11 : i64} {
  func.func @_unet_fused_kernel(%arg0: i32, %arg1: memref<1x4x256xf32, #tpu.memory_space<vmem>>, %arg2: memref<8x128xf32, #tpu.memory_space<vmem>>, %arg3: memref<4x4x32xf32, #tpu.memory_space<vmem>>, %arg4: memref<4x1xf32, #tpu.memory_space<vmem>>, %arg5: memref<4x1xf32, #tpu.memory_space<vmem>>, %arg6: memref<2x8x256xf32, #tpu.memory_space<vmem>>, %arg7: memref<8x1024xf32, #tpu.memory_space<vmem>>, %arg8: memref<8x256xf32, #tpu.memory_space<vmem>>, %arg9: memref<4x64xf32, #tpu.memory_space<vmem>>, %arg10: memref<4x64xf32, #tpu.memory_space<vmem>>) attributes {dimension_semantics = [#tpu.dimension_semantics<arbitrary>], iteration_bounds = array<i64: 2>, scalar_prefetch = 0 : i64, scratch_operands = 4 : i64, tpu.core_type = #tpu.core_type<tc>, window_params = [{transform_indices = @transform_0, window_bounds = array<i64: 1, 4, 256>}, {pipeline_mode = #tpu.pipeline_mode<synchronous>, transform_indices = @transform_1, window_bounds = array<i64: 8, 128>}, {pipeline_mode = #tpu.pipeline_mode<synchronous>, transform_indices = @transform_2, window_bounds = array<i64: 4, 4, 32>}, {pipeline_mode = #tpu.pipeline_mode<synchronous>, transform_indices = @transform_3, window_bounds = array<i64: 4, 1>}, {pipeline_mode = #tpu.pipeline_mode<synchronous>, transform_indices = @transform_4, window_bounds = array<i64: 4, 1>}, {pipeline_mode = #tpu.pipeline_mode<synchronous>, transform_indices = @transform_5, window_bounds = array<i64: 2, 8, 256>}]} {
    %c0_i32 = arith.constant 0 : i32
    %0 = arith.cmpi eq, %arg0, %c0_i32 : i32
    %1 = arith.extui %0 : i1 to i32
    %c0_i32_0 = arith.constant 0 : i32
    %2 = arith.cmpi ne, %1, %c0_i32_0 : i32
    scf.if %2 {
      %cst_138 = arith.constant 0.000000e+00 : f32
      %212 = vector.broadcast %cst_138 : f32 to vector<8x1024xf32>
      %c0_139 = arith.constant 0 : index
      %c0_140 = arith.constant 0 : index
      %213 = vector.load %arg7[%c0_139, %c0_140] : memref<8x1024xf32, #tpu.memory_space<vmem>>, vector<8x1024xf32>
      tpu.vector_store %arg7[%c0_139, %c0_140], %212 {strides = array<i32>} : memref<8x1024xf32, #tpu.memory_space<vmem>>, vector<8x1024xf32>,
      %cst_141 = arith.constant 0.000000e+00 : f32
      %214 = vector.broadcast %cst_141 : f32 to vector<8x256xf32>
      %c0_142 = arith.constant 0 : index
      %c0_143 = arith.constant 0 : index
      %215 = vector.load %arg8[%c0_142, %c0_143] : memref<8x256xf32, #tpu.memory_space<vmem>>, vector<8x256xf32>
      tpu.vector_store %arg8[%c0_142, %c0_143], %214 {strides = array<i32>} : memref<8x256xf32, #tpu.memory_space<vmem>>, vector<8x256xf32>,
      %cst_144 = arith.constant 0.000000e+00 : f32
      %216 = vector.broadcast %cst_144 : f32 to vector<4x64xf32>
      %c0_145 = arith.constant 0 : index
      %c0_146 = arith.constant 0 : index
      %217 = vector.load %arg9[%c0_145, %c0_146] : memref<4x64xf32, #tpu.memory_space<vmem>>, vector<4x64xf32>
      tpu.vector_store %arg9[%c0_145, %c0_146], %216 {strides = array<i32>} : memref<4x64xf32, #tpu.memory_space<vmem>>, vector<4x64xf32>,
      %cst_147 = arith.constant 0.000000e+00 : f32
      %218 = vector.broadcast %cst_147 : f32 to vector<4x64xf32>
      %c0_148 = arith.constant 0 : index
      %c0_149 = arith.constant 0 : index
      %219 = vector.load %arg10[%c0_148, %c0_149] : memref<4x64xf32, #tpu.memory_space<vmem>>, vector<4x64xf32>
      tpu.vector_store %arg10[%c0_148, %c0_149], %218 {strides = array<i32>} : memref<4x64xf32, #tpu.memory_space<vmem>>, vector<4x64xf32>,
    } else {
    }
    %c0 = arith.constant 0 : index
    %c0_1 = arith.constant 0 : index
    %c0_2 = arith.constant 0 : index
    %3 = vector.load %arg1[%c0, %c0_1, %c0_2] : memref<1x4x256xf32, #tpu.memory_space<vmem>>, vector<1x4x256xf32>
    %4 = vector.shape_cast %3 : vector<1x4x256xf32> to vector<4x256xf32>
    %5 = arith.index_cast %arg0 : i32 to index
    %c0_3 = arith.constant 0 : index
    %c0_4 = arith.constant 0 : index
    %6 = vector.load %arg6[%5, %c0_3, %c0_4] : memref<2x8x256xf32, #tpu.memory_space<vmem>>, vector<1x4x256xf32>
    %7 = vector.shape_cast %6 : vector<1x4x256xf32> to vector<4x256xf32>
    %8 = vector.shape_cast %4 : vector<4x256xf32> to vector<1x4x256xf32>
    tpu.vector_store %arg6[%5, %c0_3, %c0_4], %8 {strides = array<i32>} : memref<2x8x256xf32, #tpu.memory_space<vmem>>, vector<1x4x256xf32>,
    %9 = tpu.iota {dimensions = array<i32: 1>} : vector<1x64xi32>
    %c8_i32 = arith.constant 8 : i32
    %c0_i32_5 = arith.constant 0 : i32
    %10 = arith.cmpi eq, %c8_i32, %c0_i32_5 : i32
    %c1_i32 = arith.constant 1 : i32
    %11 = arith.select %10, %c1_i32, %c8_i32 : i32
    %12 = vector.broadcast %11 : i32 to vector<1x64xi32>
    %13 = arith.remsi %9, %12 : vector<1x64xi32>
    %c0_i32_6 = arith.constant 0 : i32
    %14 = vector.broadcast %c0_i32_6 : i32 to vector<1x64xi32>
    %15 = arith.cmpi ne, %13, %14 : vector<1x64xi32>
    %c0_i32_7 = arith.constant 0 : i32
    %16 = vector.broadcast %c0_i32_7 : i32 to vector<1x64xi32>
    %17 = arith.cmpi slt, %13, %16 : vector<1x64xi32>
    %c0_i32_8 = arith.constant 0 : i32
    %18 = arith.cmpi slt, %11, %c0_i32_8 : i32
    %19 = vector.broadcast %18 : i1 to vector<1x64xi1>
    %20 = vector.broadcast %19 : vector<1x64xi1> to vector<1x64xi1>
    %21 = arith.xori %17, %20 : vector<1x64xi1>
    %22 = arith.andi %21, %15 : vector<1x64xi1>
    %23 = vector.broadcast %11 : i32 to vector<1x64xi32>
    %24 = arith.addi %13, %23 : vector<1x64xi32>
    %25 = arith.select %22, %24, %13 : vector<1x64xi1>, vector<1x64xi32>
    %c0_i32_9 = arith.constant 0 : i32
    %26 = vector.broadcast %c0_i32_9 : i32 to vector<1x64xi32>
    %27 = arith.cmpi sgt, %25, %26 : vector<1x64xi32>
    %c7_i32 = arith.constant 7 : i32
    %28 = vector.broadcast %c7_i32 : i32 to vector<1x64xi32>
    %29 = arith.cmpi slt, %25, %28 : vector<1x64xi32>
    %c0_10 = arith.constant 0 : index
    %c0_11 = arith.constant 0 : index
    %c0_12 = arith.constant 0 : index
    %30 = vector.load %arg1[%c0_10, %c0_11, %c0_12] : memref<1x4x256xf32, #tpu.memory_space<vmem>>, vector<1x4x64xf32>
    %31 = vector.shape_cast %30 : vector<1x4x64xf32> to vector<4x64xf32>
    %cst = arith.constant 0.000000e+00 : f32
    %32 = vector.broadcast %cst : f32 to vector<4x64xf32>
    %33 = arith.cmpf oge, %31, %32 : vector<4x64xf32>
    %cst_13 = arith.constant 2.000000e-01 : f32
    %34 = vector.broadcast %cst_13 : f32 to vector<4x64xf32>
    %35 = arith.mulf %34, %31 : vector<4x64xf32>
    %36 = arith.select %33, %31, %35 : vector<4x64xi1>, vector<4x64xf32>
    %c0_14 = arith.constant 0 : index
    %c128 = arith.constant 128 : index
    %37 = vector.load %arg7[%c0_14, %c128] : memref<8x1024xf32, #tpu.memory_space<vmem>>, vector<4x64xf32>
    tpu.vector_store %arg7[%c0_14, %c128], %36 {strides = array<i32>} : memref<8x1024xf32, #tpu.memory_space<vmem>>, vector<4x64xf32>,
    %c0_15 = arith.constant 0 : index
    %c0_16 = arith.constant 0 : index
    %c64 = arith.constant 64 : index
    %38 = vector.load %arg1[%c0_15, %c0_16, %c64] : memref<1x4x256xf32, #tpu.memory_space<vmem>>, vector<1x4x64xf32>
    %39 = vector.shape_cast %38 : vector<1x4x64xf32> to vector<4x64xf32>
    %cst_17 = arith.constant 0.000000e+00 : f32
    %40 = vector.broadcast %cst_17 : f32 to vector<4x64xf32>
    %41 = arith.cmpf oge, %39, %40 : vector<4x64xf32>
    %cst_18 = arith.constant 2.000000e-01 : f32
    %42 = vector.broadcast %cst_18 : f32 to vector<4x64xf32>
    %43 = arith.mulf %42, %39 : vector<4x64xf32>
    %44 = arith.select %41, %39, %43 : vector<4x64xi1>, vector<4x64xf32>
    %c0_19 = arith.constant 0 : index
    %c384 = arith.constant 384 : index
    %45 = vector.load %arg7[%c0_19, %c384] : memref<8x1024xf32, #tpu.memory_space<vmem>>, vector<4x64xf32>
    tpu.vector_store %arg7[%c0_19, %c384], %44 {strides = array<i32>} : memref<8x1024xf32, #tpu.memory_space<vmem>>, vector<4x64xf32>,
    %c0_20 = arith.constant 0 : index
    %c0_21 = arith.constant 0 : index
    %c128_22 = arith.constant 128 : index
    %46 = vector.load %arg1[%c0_20, %c0_21, %c128_22] : memref<1x4x256xf32, #tpu.memory_space<vmem>>, vector<1x4x64xf32>
    %47 = vector.shape_cast %46 : vector<1x4x64xf32> to vector<4x64xf32>
    %cst_23 = arith.constant 0.000000e+00 : f32
    %48 = vector.broadcast %cst_23 : f32 to vector<4x64xf32>
    %49 = arith.cmpf oge, %47, %48 : vector<4x64xf32>
    %cst_24 = arith.constant 2.000000e-01 : f32
    %50 = vector.broadcast %cst_24 : f32 to vector<4x64xf32>
    %51 = arith.mulf %50, %47 : vector<4x64xf32>
    %52 = arith.select %49, %47, %51 : vector<4x64xi1>, vector<4x64xf32>
    %c0_25 = arith.constant 0 : index
    %c640 = arith.constant 640 : index
    %53 = vector.load %arg7[%c0_25, %c640] : memref<8x1024xf32, #tpu.memory_space<vmem>>, vector<4x64xf32>
    tpu.vector_store %arg7[%c0_25, %c640], %52 {strides = array<i32>} : memref<8x1024xf32, #tpu.memory_space<vmem>>, vector<4x64xf32>,
    %c0_26 = arith.constant 0 : index
    %c0_27 = arith.constant 0 : index
    %c192 = arith.constant 192 : index
    %54 = vector.load %arg1[%c0_26, %c0_27, %c192] : memref<1x4x256xf32, #tpu.memory_space<vmem>>, vector<1x4x64xf32>
    %55 = vector.shape_cast %54 : vector<1x4x64xf32> to vector<4x64xf32>
    %cst_28 = arith.constant 0.000000e+00 : f32
    %56 = vector.broadcast %cst_28 : f32 to vector<4x64xf32>
    %57 = arith.cmpf oge, %55, %56 : vector<4x64xf32>
    %cst_29 = arith.constant 2.000000e-01 : f32
    %58 = vector.broadcast %cst_29 : f32 to vector<4x64xf32>
    %59 = arith.mulf %58, %55 : vector<4x64xf32>
    %60 = arith.select %57, %55, %59 : vector<4x64xi1>, vector<4x64xf32>
    %c0_30 = arith.constant 0 : index
    %c896 = arith.constant 896 : index
    %61 = vector.load %arg7[%c0_30, %c896] : memref<8x1024xf32, #tpu.memory_space<vmem>>, vector<4x64xf32>
    tpu.vector_store %arg7[%c0_30, %c896], %60 {strides = array<i32>} : memref<8x1024xf32, #tpu.memory_space<vmem>>, vector<4x64xf32>,
    %c0_31 = arith.constant 0 : index
    %c887 = arith.constant 887 : index
    %62 = vector.load %arg7[%c0_31, %c887] : memref<8x1024xf32, #tpu.memory_space<vmem>>, vector<8x64xf32>
    %cst_32 = arith.constant 0.000000e+00 : f32
    %63 = vector.shape_cast %27 : vector<1x64xi1> to vector<1x64xi1>
    %64 = vector.broadcast %63 : vector<1x64xi1> to vector<8x64xi1>
    %65 = vector.broadcast %cst_32 : f32 to vector<8x64xf32>
    %66 = arith.select %64, %62, %65 : vector<8x64xi1>, vector<8x64xf32>
    %c0_33 = arith.constant 0 : index
    %c632 = arith.constant 632 : index
    %67 = vector.load %arg7[%c0_33, %c632] : memref<8x1024xf32, #tpu.memory_space<vmem>>, vector<8x64xf32>
    %c0_34 = arith.constant 0 : index
    %c888 = arith.constant 888 : index
    %68 = vector.load %arg7[%c0_34, %c888] : memref<8x1024xf32, #tpu.memory_space<vmem>>, vector<8x64xf32>
    %c0_35 = arith.constant 0 : index
    %c633 = arith.constant 633 : index
    %69 = vector.load %arg7[%c0_35, %c633] : memref<8x1024xf32, #tpu.memory_space<vmem>>, vector<8x64xf32>
    %cst_36 = arith.constant 0.000000e+00 : f32
    %70 = vector.shape_cast %29 : vector<1x64xi1> to vector<1x64xi1>
    %71 = vector.broadcast %70 : vector<1x64xi1> to vector<8x64xi1>
    %72 = vector.broadcast %cst_36 : f32 to vector<8x64xf32>
    %73 = arith.select %71, %69, %72 : vector<8x64xi1>, vector<8x64xf32>
    %c0_37 = arith.constant 0 : index
    %c383 = arith.constant 383 : index
    %74 = vector.load %arg7[%c0_37, %c383] : memref<8x1024xf32, #tpu.memory_space<vmem>>, vector<8x64xf32>
    %cst_38 = arith.constant 0.000000e+00 : f32
    %75 = vector.shape_cast %27 : vector<1x64xi1> to vector<1x64xi1>
    %76 = vector.broadcast %75 : vector<1x64xi1> to vector<8x64xi1>
    %77 = vector.broadcast %cst_38 : f32 to vector<8x64xf32>
    %78 = arith.select %76, %74, %77 : vector<8x64xi1>, vector<8x64xf32>
    %c0_39 = arith.constant 0 : index
    %c128_40 = arith.constant 128 : index
    %79 = vector.load %arg7[%c0_39, %c128_40] : memref<8x1024xf32, #tpu.memory_space<vmem>>, vector<8x64xf32>
    %c0_41 = arith.constant 0 : index
    %c384_42 = arith.constant 384 : index
    %80 = vector.load %arg7[%c0_41, %c384_42] : memref<8x1024xf32, #tpu.memory_space<vmem>>, vector<8x64xf32>
    %c0_43 = arith.constant 0 : index
    %c129 = arith.constant 129 : index
    %81 = vector.load %arg7[%c0_43, %c129] : memref<8x1024xf32, #tpu.memory_space<vmem>>, vector<8x64xf32>
    %cst_44 = arith.constant 0.000000e+00 : f32
    %82 = vector.shape_cast %29 : vector<1x64xi1> to vector<1x64xi1>
    %83 = vector.broadcast %82 : vector<1x64xi1> to vector<8x64xi1>
    %84 = vector.broadcast %cst_44 : f32 to vector<8x64xf32>
    %85 = arith.select %83, %81, %84 : vector<8x64xi1>, vector<8x64xf32>
    %c0_45 = arith.constant 0 : index
    %c895 = arith.constant 895 : index
    %86 = vector.load %arg7[%c0_45, %c895] : memref<8x1024xf32, #tpu.memory_space<vmem>>, vector<8x64xf32>
    %cst_46 = arith.constant 0.000000e+00 : f32
    %87 = vector.shape_cast %27 : vector<1x64xi1> to vector<1x64xi1>
    %88 = vector.broadcast %87 : vector<1x64xi1> to vector<8x64xi1>
    %89 = vector.broadcast %cst_46 : f32 to vector<8x64xf32>
    %90 = arith.select %88, %86, %89 : vector<8x64xi1>, vector<8x64xf32>
    %c0_47 = arith.constant 0 : index
    %c640_48 = arith.constant 640 : index
    %91 = vector.load %arg7[%c0_47, %c640_48] : memref<8x1024xf32, #tpu.memory_space<vmem>>, vector<8x64xf32>
    %c0_49 = arith.constant 0 : index
    %c896_50 = arith.constant 896 : index
    %92 = vector.load %arg7[%c0_49, %c896_50] : memref<8x1024xf32, #tpu.memory_space<vmem>>, vector<8x64xf32>
    %c0_51 = arith.constant 0 : index
    %c641 = arith.constant 641 : index
    %93 = vector.load %arg7[%c0_51, %c641] : memref<8x1024xf32, #tpu.memory_space<vmem>>, vector<8x64xf32>
    %cst_52 = arith.constant 0.000000e+00 : f32
    %94 = vector.shape_cast %29 : vector<1x64xi1> to vector<1x64xi1>
    %95 = vector.broadcast %94 : vector<1x64xi1> to vector<8x64xi1>
    %96 = vector.broadcast %cst_52 : f32 to vector<8x64xf32>
    %97 = arith.select %95, %93, %96 : vector<8x64xi1>, vector<8x64xf32>
    %c0_53 = arith.constant 0 : index
    %c391 = arith.constant 391 : index
    %98 = vector.load %arg7[%c0_53, %c391] : memref<8x1024xf32, #tpu.memory_space<vmem>>, vector<8x64xf32>
    %cst_54 = arith.constant 0.000000e+00 : f32
    %99 = vector.shape_cast %27 : vector<1x64xi1> to vector<1x64xi1>
    %100 = vector.broadcast %99 : vector<1x64xi1> to vector<8x64xi1>
    %101 = vector.broadcast %cst_54 : f32 to vector<8x64xf32>
    %102 = arith.select %100, %98, %101 : vector<8x64xi1>, vector<8x64xf32>
    %c0_55 = arith.constant 0 : index
    %c136 = arith.constant 136 : index
    %103 = vector.load %arg7[%c0_55, %c136] : memref<8x1024xf32, #tpu.memory_space<vmem>>, vector<8x64xf32>
    %c0_56 = arith.constant 0 : index
    %c392 = arith.constant 392 : index
    %104 = vector.load %arg7[%c0_56, %c392] : memref<8x1024xf32, #tpu.memory_space<vmem>>, vector<8x64xf32>
    %c0_57 = arith.constant 0 : index
    %c137 = arith.constant 137 : index
    %105 = vector.load %arg7[%c0_57, %c137] : memref<8x1024xf32, #tpu.memory_space<vmem>>, vector<8x64xf32>
    %cst_58 = arith.constant 0.000000e+00 : f32
    %106 = vector.shape_cast %29 : vector<1x64xi1> to vector<1x64xi1>
    %107 = vector.broadcast %106 : vector<1x64xi1> to vector<8x64xi1>
    %108 = vector.broadcast %cst_58 : f32 to vector<8x64xf32>
    %109 = arith.select %107, %105, %108 : vector<8x64xi1>, vector<8x64xf32>
    %110 = tpu.concatenate %66, %67, %68, %73, %78, %79, %80, %85, %90, %91, %92, %97, %102, %103, %104, %109 in 0 : vector<8x64xf32>, vector<8x64xf32>, vector<8x64xf32>, vector<8x64xf32>, vector<8x64xf32>, vector<8x64xf32>, vector<8x64xf32>, vector<8x64xf32>, vector<8x64xf32>, vector<8x64xf32>, vector<8x64xf32>, vector<8x64xf32>, vector<8x64xf32>, vector<8x64xf32>, vector<8x64xf32>, vector<8x64xf32> -> vector<128x64xf32>
    %c0_59 = arith.constant 0 : index
    %c0_60 = arith.constant 0 : index
    %111 = vector.load %arg2[%c0_59, %c0_60] : memref<8x128xf32, #tpu.memory_space<vmem>>, vector<8x128xf32>
    %cst_61 = arith.constant dense<0.000000e+00> : vector<8x64xf32>
    %112 = tpu.matmul %111, %110, %cst_61 {dimension_numbers = #tpu.dot_dimension_numbers<[1], [0], [0], [1], [0, 0, 1, 1], [], []>} : vector<8x128xf32>, vector<128x64xf32>, vector<8x64xf32> -> vector<8x64xf32>
    %cst_62 = arith.constant 0.000000e+00 : f32
    %113 = vector.broadcast %cst_62 : f32 to vector<8x64xf32>
    %114 = arith.maximumf %112, %113 : vector<8x64xf32>
    %c0_63 = arith.constant 0 : index
    %c128_64 = arith.constant 128 : index
    %115 = vector.load %arg8[%c0_63, %c128_64] : memref<8x256xf32, #tpu.memory_space<vmem>>, vector<8x64xf32>
    tpu.vector_store %arg8[%c0_63, %c128_64], %114 {strides = array<i32>} : memref<8x256xf32, #tpu.memory_space<vmem>>, vector<8x64xf32>,
    %c0_65 = arith.constant 0 : index
    %c119 = arith.constant 119 : index
    %116 = vector.load %arg8[%c0_65, %c119] : memref<8x256xf32, #tpu.memory_space<vmem>>, vector<8x64xf32>
    %cst_66 = arith.constant 0.000000e+00 : f32
    %117 = vector.shape_cast %27 : vector<1x64xi1> to vector<1x64xi1>
    %118 = vector.broadcast %117 : vector<1x64xi1> to vector<8x64xi1>
    %119 = vector.broadcast %cst_66 : f32 to vector<8x64xf32>
    %120 = arith.select %118, %116, %119 : vector<8x64xi1>, vector<8x64xf32>
    %c0_67 = arith.constant 0 : index
    %c120 = arith.constant 120 : index
    %121 = vector.load %arg8[%c0_67, %c120] : memref<8x256xf32, #tpu.memory_space<vmem>>, vector<8x64xf32>
    %c0_68 = arith.constant 0 : index
    %c121 = arith.constant 121 : index
    %122 = vector.load %arg8[%c0_68, %c121] : memref<8x256xf32, #tpu.memory_space<vmem>>, vector<8x64xf32>
    %cst_69 = arith.constant 0.000000e+00 : f32
    %123 = vector.shape_cast %29 : vector<1x64xi1> to vector<1x64xi1>
    %124 = vector.broadcast %123 : vector<1x64xi1> to vector<8x64xi1>
    %125 = vector.broadcast %cst_69 : f32 to vector<8x64xf32>
    %126 = arith.select %124, %122, %125 : vector<8x64xi1>, vector<8x64xf32>
    %c0_70 = arith.constant 0 : index
    %c127 = arith.constant 127 : index
    %127 = vector.load %arg8[%c0_70, %c127] : memref<8x256xf32, #tpu.memory_space<vmem>>, vector<8x64xf32>
    %cst_71 = arith.constant 0.000000e+00 : f32
    %128 = vector.shape_cast %27 : vector<1x64xi1> to vector<1x64xi1>
    %129 = vector.broadcast %128 : vector<1x64xi1> to vector<8x64xi1>
    %130 = vector.broadcast %cst_71 : f32 to vector<8x64xf32>
    %131 = arith.select %129, %127, %130 : vector<8x64xi1>, vector<8x64xf32>
    %c0_72 = arith.constant 0 : index
    %c128_73 = arith.constant 128 : index
    %132 = vector.load %arg8[%c0_72, %c128_73] : memref<8x256xf32, #tpu.memory_space<vmem>>, vector<8x64xf32>
    %c0_74 = arith.constant 0 : index
    %c129_75 = arith.constant 129 : index
    %133 = vector.load %arg8[%c0_74, %c129_75] : memref<8x256xf32, #tpu.memory_space<vmem>>, vector<8x64xf32>
    %cst_76 = arith.constant 0.000000e+00 : f32
    %134 = vector.shape_cast %29 : vector<1x64xi1> to vector<1x64xi1>
    %135 = vector.broadcast %134 : vector<1x64xi1> to vector<8x64xi1>
    %136 = vector.broadcast %cst_76 : f32 to vector<8x64xf32>
    %137 = arith.select %135, %133, %136 : vector<8x64xi1>, vector<8x64xf32>
    %c0_77 = arith.constant 0 : index
    %c135 = arith.constant 135 : index
    %138 = vector.load %arg8[%c0_77, %c135] : memref<8x256xf32, #tpu.memory_space<vmem>>, vector<8x64xf32>
    %cst_78 = arith.constant 0.000000e+00 : f32
    %139 = vector.shape_cast %27 : vector<1x64xi1> to vector<1x64xi1>
    %140 = vector.broadcast %139 : vector<1x64xi1> to vector<8x64xi1>
    %141 = vector.broadcast %cst_78 : f32 to vector<8x64xf32>
    %142 = arith.select %140, %138, %141 : vector<8x64xi1>, vector<8x64xf32>
    %c0_79 = arith.constant 0 : index
    %c136_80 = arith.constant 136 : index
    %143 = vector.load %arg8[%c0_79, %c136_80] : memref<8x256xf32, #tpu.memory_space<vmem>>, vector<8x64xf32>
    %c0_81 = arith.constant 0 : index
    %c137_82 = arith.constant 137 : index
    %144 = vector.load %arg8[%c0_81, %c137_82] : memref<8x256xf32, #tpu.memory_space<vmem>>, vector<8x64xf32>
    %cst_83 = arith.constant 0.000000e+00 : f32
    %145 = vector.shape_cast %29 : vector<1x64xi1> to vector<1x64xi1>
    %146 = vector.broadcast %145 : vector<1x64xi1> to vector<8x64xi1>
    %147 = vector.broadcast %cst_83 : f32 to vector<8x64xf32>
    %148 = arith.select %146, %144, %147 : vector<8x64xi1>, vector<8x64xf32>
    %149 = tpu.concatenate %132, %131, %121, %120 in 0 : vector<8x64xf32>, vector<8x64xf32>, vector<8x64xf32>, vector<8x64xf32> -> vector<32x64xf32>
    %c0_84 = arith.constant 0 : index
    %c0_85 = arith.constant 0 : index
    %c0_86 = arith.constant 0 : index
    %150 = vector.load %arg3[%c0_84, %c0_85, %c0_86] : memref<4x4x32xf32, #tpu.memory_space<vmem>>, vector<1x4x32xf32>
    %151 = vector.shape_cast %150 : vector<1x4x32xf32> to vector<4x32xf32>
    %cst_87 = arith.constant dense<0.000000e+00> : vector<4x64xf32>
    %152 = tpu.matmul %151, %149, %cst_87 {dimension_numbers = #tpu.dot_dimension_numbers<[1], [0], [0], [1], [0, 0, 1, 1], [], []>} : vector<4x32xf32>, vector<32x64xf32>, vector<4x64xf32> -> vector<4x64xf32>
    %153 = arith.index_cast %arg0 : i32 to index
    %c4 = arith.constant 4 : index
    %c0_88 = arith.constant 0 : index
    %154 = vector.load %arg6[%153, %c4, %c0_88] : memref<2x8x256xf32, #tpu.memory_space<vmem>>, vector<1x4x64xf32>
    %155 = vector.shape_cast %154 : vector<1x4x64xf32> to vector<4x64xf32>
    %156 = vector.shape_cast %152 : vector<4x64xf32> to vector<1x4x64xf32>
    tpu.vector_store %arg6[%153, %c4, %c0_88], %156 {strides = array<i32>} : memref<2x8x256xf32, #tpu.memory_space<vmem>>, vector<1x4x64xf32>,
    %c0_89 = arith.constant 0 : index
    %c0_90 = arith.constant 0 : index
    %157 = vector.load %arg9[%c0_89, %c0_90] : memref<4x64xf32, #tpu.memory_space<vmem>>, vector<4x64xf32>
    %158 = arith.addf %157, %152 : vector<4x64xf32>
    %c0_91 = arith.constant 0 : index
    %c0_92 = arith.constant 0 : index
    %159 = vector.load %arg9[%c0_91, %c0_92] : memref<4x64xf32, #tpu.memory_space<vmem>>, vector<4x64xf32>
    tpu.vector_store %arg9[%c0_91, %c0_92], %158 {strides = array<i32>} : memref<4x64xf32, #tpu.memory_space<vmem>>, vector<4x64xf32>,
    %c0_93 = arith.constant 0 : index
    %c0_94 = arith.constant 0 : index
    %160 = vector.load %arg10[%c0_93, %c0_94] : memref<4x64xf32, #tpu.memory_space<vmem>>, vector<4x64xf32>
    %161 = arith.mulf %152, %152 : vector<4x64xf32>
    %162 = arith.addf %160, %161 : vector<4x64xf32>
    %c0_95 = arith.constant 0 : index
    %c0_96 = arith.constant 0 : index
    %163 = vector.load %arg10[%c0_95, %c0_96] : memref<4x64xf32, #tpu.memory_space<vmem>>, vector<4x64xf32>
    tpu.vector_store %arg10[%c0_95, %c0_96], %162 {strides = array<i32>} : memref<4x64xf32, #tpu.memory_space<vmem>>, vector<4x64xf32>,
    %164 = tpu.concatenate %137, %132, %126, %121 in 0 : vector<8x64xf32>, vector<8x64xf32>, vector<8x64xf32>, vector<8x64xf32> -> vector<32x64xf32>
    %c1 = arith.constant 1 : index
    %c0_97 = arith.constant 0 : index
    %c0_98 = arith.constant 0 : index
    %165 = vector.load %arg3[%c1, %c0_97, %c0_98] : memref<4x4x32xf32, #tpu.memory_space<vmem>>, vector<1x4x32xf32>
    %166 = vector.shape_cast %165 : vector<1x4x32xf32> to vector<4x32xf32>
    %cst_99 = arith.constant dense<0.000000e+00> : vector<4x64xf32>
    %167 = tpu.matmul %166, %164, %cst_99 {dimension_numbers = #tpu.dot_dimension_numbers<[1], [0], [0], [1], [0, 0, 1, 1], [], []>} : vector<4x32xf32>, vector<32x64xf32>, vector<4x64xf32> -> vector<4x64xf32>
    %168 = arith.index_cast %arg0 : i32 to index
    %c4_100 = arith.constant 4 : index
    %c64_101 = arith.constant 64 : index
    %169 = vector.load %arg6[%168, %c4_100, %c64_101] : memref<2x8x256xf32, #tpu.memory_space<vmem>>, vector<1x4x64xf32>
    %170 = vector.shape_cast %169 : vector<1x4x64xf32> to vector<4x64xf32>
    %171 = vector.shape_cast %167 : vector<4x64xf32> to vector<1x4x64xf32>
    tpu.vector_store %arg6[%168, %c4_100, %c64_101], %171 {strides = array<i32>} : memref<2x8x256xf32, #tpu.memory_space<vmem>>, vector<1x4x64xf32>,
    %c0_102 = arith.constant 0 : index
    %c0_103 = arith.constant 0 : index
    %172 = vector.load %arg9[%c0_102, %c0_103] : memref<4x64xf32, #tpu.memory_space<vmem>>, vector<4x64xf32>
    %173 = arith.addf %172, %167 : vector<4x64xf32>
    %c0_104 = arith.constant 0 : index
    %c0_105 = arith.constant 0 : index
    %174 = vector.load %arg9[%c0_104, %c0_105] : memref<4x64xf32, #tpu.memory_space<vmem>>, vector<4x64xf32>
    tpu.vector_store %arg9[%c0_104, %c0_105], %173 {strides = array<i32>} : memref<4x64xf32, #tpu.memory_space<vmem>>, vector<4x64xf32>,
    %c0_106 = arith.constant 0 : index
    %c0_107 = arith.constant 0 : index
    %175 = vector.load %arg10[%c0_106, %c0_107] : memref<4x64xf32, #tpu.memory_space<vmem>>, vector<4x64xf32>
    %176 = arith.mulf %167, %167 : vector<4x64xf32>
    %177 = arith.addf %175, %176 : vector<4x64xf32>
    %c0_108 = arith.constant 0 : index
    %c0_109 = arith.constant 0 : index
    %178 = vector.load %arg10[%c0_108, %c0_109] : memref<4x64xf32, #tpu.memory_space<vmem>>, vector<4x64xf32>
    tpu.vector_store %arg10[%c0_108, %c0_109], %177 {strides = array<i32>} : memref<4x64xf32, #tpu.memory_space<vmem>>, vector<4x64xf32>,
    %179 = tpu.concatenate %143, %142, %132, %131 in 0 : vector<8x64xf32>, vector<8x64xf32>, vector<8x64xf32>, vector<8x64xf32> -> vector<32x64xf32>
    %c2 = arith.constant 2 : index
    %c0_110 = arith.constant 0 : index
    %c0_111 = arith.constant 0 : index
    %180 = vector.load %arg3[%c2, %c0_110, %c0_111] : memref<4x4x32xf32, #tpu.memory_space<vmem>>, vector<1x4x32xf32>
    %181 = vector.shape_cast %180 : vector<1x4x32xf32> to vector<4x32xf32>
    %cst_112 = arith.constant dense<0.000000e+00> : vector<4x64xf32>
    %182 = tpu.matmul %181, %179, %cst_112 {dimension_numbers = #tpu.dot_dimension_numbers<[1], [0], [0], [1], [0, 0, 1, 1], [], []>} : vector<4x32xf32>, vector<32x64xf32>, vector<4x64xf32> -> vector<4x64xf32>
    %183 = arith.index_cast %arg0 : i32 to index
    %c4_113 = arith.constant 4 : index
    %c128_114 = arith.constant 128 : index
    %184 = vector.load %arg6[%183, %c4_113, %c128_114] : memref<2x8x256xf32, #tpu.memory_space<vmem>>, vector<1x4x64xf32>
    %185 = vector.shape_cast %184 : vector<1x4x64xf32> to vector<4x64xf32>
    %186 = vector.shape_cast %182 : vector<4x64xf32> to vector<1x4x64xf32>
    tpu.vector_store %arg6[%183, %c4_113, %c128_114], %186 {strides = array<i32>} : memref<2x8x256xf32, #tpu.memory_space<vmem>>, vector<1x4x64xf32>,
    %c0_115 = arith.constant 0 : index
    %c0_116 = arith.constant 0 : index
    %187 = vector.load %arg9[%c0_115, %c0_116] : memref<4x64xf32, #tpu.memory_space<vmem>>, vector<4x64xf32>
    %188 = arith.addf %187, %182 : vector<4x64xf32>
    %c0_117 = arith.constant 0 : index
    %c0_118 = arith.constant 0 : index
    %189 = vector.load %arg9[%c0_117, %c0_118] : memref<4x64xf32, #tpu.memory_space<vmem>>, vector<4x64xf32>
    tpu.vector_store %arg9[%c0_117, %c0_118], %188 {strides = array<i32>} : memref<4x64xf32, #tpu.memory_space<vmem>>, vector<4x64xf32>,
    %c0_119 = arith.constant 0 : index
    %c0_120 = arith.constant 0 : index
    %190 = vector.load %arg10[%c0_119, %c0_120] : memref<4x64xf32, #tpu.memory_space<vmem>>, vector<4x64xf32>
    %191 = arith.mulf %182, %182 : vector<4x64xf32>
    %192 = arith.addf %190, %191 : vector<4x64xf32>
    %c0_121 = arith.constant 0 : index
    %c0_122 = arith.constant 0 : index
    %193 = vector.load %arg10[%c0_121, %c0_122] : memref<4x64xf32, #tpu.memory_space<vmem>>, vector<4x64xf32>
    tpu.vector_store %arg10[%c0_121, %c0_122], %192 {strides = array<i32>} : memref<4x64xf32, #tpu.memory_space<vmem>>, vector<4x64xf32>,
    %194 = tpu.concatenate %148, %143, %137, %132 in 0 : vector<8x64xf32>, vector<8x64xf32>, vector<8x64xf32>, vector<8x64xf32> -> vector<32x64xf32>
    %c3 = arith.constant 3 : index
    %c0_123 = arith.constant 0 : index
    %c0_124 = arith.constant 0 : index
    %195 = vector.load %arg3[%c3, %c0_123, %c0_124] : memref<4x4x32xf32, #tpu.memory_space<vmem>>, vector<1x4x32xf32>
    %196 = vector.shape_cast %195 : vector<1x4x32xf32> to vector<4x32xf32>
    %cst_125 = arith.constant dense<0.000000e+00> : vector<4x64xf32>
    %197 = tpu.matmul %196, %194, %cst_125 {dimension_numbers = #tpu.dot_dimension_numbers<[1], [0], [0], [1], [0, 0, 1, 1], [], []>} : vector<4x32xf32>, vector<32x64xf32>, vector<4x64xf32> -> vector<4x64xf32>
    %198 = arith.index_cast %arg0 : i32 to index
    %c4_126 = arith.constant 4 : index
    %c192_127 = arith.constant 192 : index
    %199 = vector.load %arg6[%198, %c4_126, %c192_127] : memref<2x8x256xf32, #tpu.memory_space<vmem>>, vector<1x4x64xf32>
    %200 = vector.shape_cast %199 : vector<1x4x64xf32> to vector<4x64xf32>
    %201 = vector.shape_cast %197 : vector<4x64xf32> to vector<1x4x64xf32>
    tpu.vector_store %arg6[%198, %c4_126, %c192_127], %201 {strides = array<i32>} : memref<2x8x256xf32, #tpu.memory_space<vmem>>, vector<1x4x64xf32>,
    %c0_128 = arith.constant 0 : index
    %c0_129 = arith.constant 0 : index
    %202 = vector.load %arg9[%c0_128, %c0_129] : memref<4x64xf32, #tpu.memory_space<vmem>>, vector<4x64xf32>
    %203 = arith.addf %202, %197 : vector<4x64xf32>
    %c0_130 = arith.constant 0 : index
    %c0_131 = arith.constant 0 : index
    %204 = vector.load %arg9[%c0_130, %c0_131] : memref<4x64xf32, #tpu.memory_space<vmem>>, vector<4x64xf32>
    tpu.vector_store %arg9[%c0_130, %c0_131], %203 {strides = array<i32>} : memref<4x64xf32, #tpu.memory_space<vmem>>, vector<4x64xf32>,
    %c0_132 = arith.constant 0 : index
    %c0_133 = arith.constant 0 : index
    %205 = vector.load %arg10[%c0_132, %c0_133] : memref<4x64xf32, #tpu.memory_space<vmem>>, vector<4x64xf32>
    %206 = arith.mulf %197, %197 : vector<4x64xf32>
    %207 = arith.addf %205, %206 : vector<4x64xf32>
    %c0_134 = arith.constant 0 : index
    %c0_135 = arith.constant 0 : index
    %208 = vector.load %arg10[%c0_134, %c0_135] : memref<4x64xf32, #tpu.memory_space<vmem>>, vector<4x64xf32>
    tpu.vector_store %arg10[%c0_134, %c0_135], %207 {strides = array<i32>} : memref<4x64xf32, #tpu.memory_space<vmem>>, vector<4x64xf32>,
    %c1_i32_136 = arith.constant 1 : i32
    %209 = arith.cmpi eq, %arg0, %c1_i32_136 : i32
    %210 = arith.extui %209 : i1 to i32
    %c0_i32_137 = arith.constant 0 : i32
    %211 = arith.cmpi ne, %210, %c0_i32_137 : i32
    scf.if %211 {
      %c0_138 = arith.constant 0 : index
      %c0_139 = arith.constant 0 : index
      %212 = vector.load %arg9[%c0_138, %c0_139] : memref<4x64xf32, #tpu.memory_space<vmem>>, vector<4x64xf32>
      %cst_140 = arith.constant dense<0.000000e+00> : vector<4xf32>
      %213 = vector.multi_reduction <add>, %212, %cst_140 [1] : vector<4x64xf32> to vector<4xf32>
      %214 = vector.shape_cast %213 : vector<4xf32> to vector<4x1xf32>
      %c0_141 = arith.constant 0 : index
      %c0_142 = arith.constant 0 : index
      %215 = vector.load %arg10[%c0_141, %c0_142] : memref<4x64xf32, #tpu.memory_space<vmem>>, vector<4x64xf32>
      %cst_143 = arith.constant dense<0.000000e+00> : vector<4xf32>
      %216 = vector.multi_reduction <add>, %215, %cst_143 [1] : vector<4x64xf32> to vector<4xf32>
      %217 = vector.shape_cast %216 : vector<4xf32> to vector<4x1xf32>
      %cst_144 = arith.constant 5.120000e+02 : f32
      %218 = vector.broadcast %cst_144 : f32 to vector<4x1xf32>
      %219 = arith.divf %214, %218 : vector<4x1xf32>
      %cst_145 = arith.constant 5.120000e+02 : f32
      %220 = vector.broadcast %cst_145 : f32 to vector<4x1xf32>
      %221 = arith.divf %217, %220 : vector<4x1xf32>
      %222 = arith.mulf %219, %219 : vector<4x1xf32>
      %223 = arith.subf %221, %222 : vector<4x1xf32>
      %c0_146 = arith.constant 0 : index
      %c0_147 = arith.constant 0 : index
      %224 = vector.load %arg4[%c0_146, %c0_147] : memref<4x1xf32, #tpu.memory_space<vmem>>, vector<4x1xf32>
      %cst_148 = arith.constant 9.99999974E-6 : f32
      %225 = vector.broadcast %cst_148 : f32 to vector<4x1xf32>
      %226 = arith.addf %223, %225 : vector<4x1xf32>
      %227 = math.rsqrt %226 : vector<4x1xf32>
      %228 = arith.mulf %224, %227 : vector<4x1xf32>
      %c0_149 = arith.constant 0 : index
      %c0_150 = arith.constant 0 : index
      %229 = vector.load %arg5[%c0_149, %c0_150] : memref<4x1xf32, #tpu.memory_space<vmem>>, vector<4x1xf32>
      %230 = arith.mulf %219, %228 : vector<4x1xf32>
      %231 = arith.subf %229, %230 : vector<4x1xf32>
      %c0_151 = arith.constant 0 : index
      %c4_152 = arith.constant 4 : index
      %c0_153 = arith.constant 0 : index
      %232 = vector.load %arg6[%c0_151, %c4_152, %c0_153] : memref<2x8x256xf32, #tpu.memory_space<vmem>>, vector<1x4x256xf32>
      %233 = vector.shape_cast %232 : vector<1x4x256xf32> to vector<4x256xf32>
      %234 = vector.broadcast %228 : vector<4x1xf32> to vector<4x256xf32>
      %235 = arith.mulf %233, %234 : vector<4x256xf32>
      %236 = vector.broadcast %231 : vector<4x1xf32> to vector<4x256xf32>
      %237 = arith.addf %235, %236 : vector<4x256xf32>
      %c0_154 = arith.constant 0 : index
      %c4_155 = arith.constant 4 : index
      %c0_156 = arith.constant 0 : index
      %238 = vector.load %arg6[%c0_154, %c4_155, %c0_156] : memref<2x8x256xf32, #tpu.memory_space<vmem>>, vector<1x4x256xf32>
      %239 = vector.shape_cast %238 : vector<1x4x256xf32> to vector<4x256xf32>
      %240 = vector.shape_cast %237 : vector<4x256xf32> to vector<1x4x256xf32>
      tpu.vector_store %arg6[%c0_154, %c4_155, %c0_156], %240 {strides = array<i32>} : memref<2x8x256xf32, #tpu.memory_space<vmem>>, vector<1x4x256xf32>,
      %c1_157 = arith.constant 1 : index
      %c4_158 = arith.constant 4 : index
      %c0_159 = arith.constant 0 : index
      %241 = vector.load %arg6[%c1_157, %c4_158, %c0_159] : memref<2x8x256xf32, #tpu.memory_space<vmem>>, vector<1x4x256xf32>
      %242 = vector.shape_cast %241 : vector<1x4x256xf32> to vector<4x256xf32>
      %243 = vector.broadcast %228 : vector<4x1xf32> to vector<4x256xf32>
      %244 = arith.mulf %242, %243 : vector<4x256xf32>
      %245 = vector.broadcast %231 : vector<4x1xf32> to vector<4x256xf32>
      %246 = arith.addf %244, %245 : vector<4x256xf32>
      %c1_160 = arith.constant 1 : index
      %c4_161 = arith.constant 4 : index
      %c0_162 = arith.constant 0 : index
      %247 = vector.load %arg6[%c1_160, %c4_161, %c0_162] : memref<2x8x256xf32, #tpu.memory_space<vmem>>, vector<1x4x256xf32>
      %248 = vector.shape_cast %247 : vector<1x4x256xf32> to vector<4x256xf32>
      %249 = vector.shape_cast %246 : vector<4x256xf32> to vector<1x4x256xf32>
      tpu.vector_store %arg6[%c1_160, %c4_161, %c0_162], %249 {strides = array<i32>} : memref<2x8x256xf32, #tpu.memory_space<vmem>>, vector<1x4x256xf32>,
    } else {
    }
    return
  }
  func.func @transform_0(%arg0: i32) -> (i32, i32, i32) {
    %c0_i32 = arith.constant 0 : i32
    %c0_i32_0 = arith.constant 0 : i32
    %c0_i32_1 = arith.constant 0 : i32
    return %arg0, %c0_i32, %c0_i32_0 : i32, i32, i32
  }
  func.func @transform_1(%arg0: i32) -> (i32, i32) {
    %c0_i32 = arith.constant 0 : i32
    %c0_i32_0 = arith.constant 0 : i32
    %c0_i32_1 = arith.constant 0 : i32
    return %c0_i32, %c0_i32_0 : i32, i32
  }
  func.func @transform_2(%arg0: i32) -> (i32, i32, i32) {
    %c0_i32 = arith.constant 0 : i32
    %c0_i32_0 = arith.constant 0 : i32
    %c0_i32_1 = arith.constant 0 : i32
    %c0_i32_2 = arith.constant 0 : i32
    return %c0_i32, %c0_i32_0, %c0_i32_1 : i32, i32, i32
  }
  func.func @transform_3(%arg0: i32) -> (i32, i32) {
    %c0_i32 = arith.constant 0 : i32
    %c0_i32_0 = arith.constant 0 : i32
    %c0_i32_1 = arith.constant 0 : i32
    return %c0_i32, %c0_i32_0 : i32, i32
  }
  func.func @transform_4(%arg0: i32) -> (i32, i32) {
    %c0_i32 = arith.constant 0 : i32
    %c0_i32_0 = arith.constant 0 : i32
    %c0_i32_1 = arith.constant 0 : i32
    return %c0_i32, %c0_i32_0 : i32, i32
  }
  func.func @transform_5(%arg0: i32) -> (i32, i32, i32) {
    %c0_i32 = arith.constant 0 : i32
    %c0_i32_0 = arith.constant 0 : i32
    %c0_i32_1 = arith.constant 0 : i32
    %c0_i32_2 = arith.constant 0 : i32
    return %c0_i32, %c0_i32_0, %c0_i32_1 : i32, i32, i32
  }
}

</mosaic_0001>

<bundles_post_ra>
// kernel: unet_innermost_forward.1
= control target key start
LH: loop header
LB: loop body
LE: loop exit
PB: predicated region body
PF: predicated region fallthrough
CT: control target
= control target key end

     0   :  { %s845_s18 = smov 0   ;;  %s1047_s0 = inlined_call_operand.vmem [shape: f32[2,4,256], index: 0, kind: input, shape index: {}]   ;;  %s1048_s1 = inlined_call_operand.vmem [shape: f32[8,128], index: 1, kind: input, shape index: {}]   ;;  %s1049_s2 = inlined_call_operand.vmem [shape: f32[4,4,32], index: 2, kind: input, shape index: {}]   ;;  %s1050_s3 = inlined_call_operand.vmem [shape: f32[4,1], index: 3, kind: input, shape index: {}]   ;;  %s1051_s4 = inlined_call_operand.vmem [shape: f32[4,1], index: 4, kind: input, shape index: {}]   ;;  %s1052_s5 = inlined_call_operand.vmem [shape: f32[2,8,256], index: 5, kind: output, shape index: {}]  }
   0x1 LB: > { %s851_s19 = sadd.s32 4294967295, %s801_s18   ;;  %p708_p0 = scmp.ge.s32.totalorder %s801_s18, 1  ;;  %s801_s18 = sphi %s845_s18, %s15_s18  }
   0x2   : > { %p182_p1 = scmp.lt.s32.totalorder %s801_s18, 3 }
   0x4   : > { %p183_p2 = pnand %p708_p0, %p182_p1 }
   0x5   : > { %p205_p3 = scmp.lt.s32.totalorder (!%p183_p2), %s851_s19, 1  ;;  %p711_p4 = scmp.ne.s32.totalorder (!%p183_p2), %s851_s19, 0 }
   0x6   : > { %186 = sbr.rel (%p183_p2) target bundleno = 1240 (0x4d8), region = 40 }
   0xb   : > { %s206_s20 = scalar_select %p205_p3, %s851_s19, 1 }
   0xc   : > { %213 = sbr.rel (%p711_p4) target bundleno = 29 (0x1d), region = 44 }
   0xd   : > { %s742_s21 = sshll.u32 %s206_s20, 3 }
   0xe   : > { %s860_s24 = scalar_lea.vmem %s1047_s0, %s742_s21 }
  0x11   : > { %v803_v0 = vmov 0.0   ;;  %vm224_vm0 = vcmask 519168  }
  0x12   : > { %215 = vst [vmem:[#allocation2 + $0x8] sm:$0xff] %v803_v0 }
  0x13   : > { %216 = vst [vmem:[#allocation2 + $0x10] sm:$0xff] %v803_v0 }
  0x14   : > { %217 = vst [vmem:[#allocation2 + $0x18] sm:$0xff] %v803_v0 }
  0x15   : > { %218 = vst [vmem:[#allocation2 + $0x20] sm:$0xff] %v803_v0 }
  0x16   : > { %219 = vst [vmem:[#allocation2 + $0x28] sm:$0xff] %v803_v0 }
  0x17   : > { %220 = vst [vmem:[#allocation2 + $0x30] sm:$0xff] %v803_v0 }
  0x18   : > { %221 = vst [vmem:[#allocation2 + $0x38] sm:$0xff] %v803_v0 }
  0x19   : > { %222 = vst [vmem:[#allocation3] sm:$0xff] %v803_v0 }
  0x1a   : > { %223 = vst [vmem:[#allocation3 + $0x8] sm:$0xff] %v803_v0 }
  0x1b   : > { %225 = vst.msk [vmem:[#allocation4] sm:$0xf] %vm224_vm0, %v803_v0 }
  0x1c   : > { %226 = vst.msk [vmem:[#allocation5] sm:$0xf] %vm224_vm0, %v803_v0 }
  0x1d PF: > { %v227_v1 = vld [vmem:[%s860_s24] sm:$0xff]  ;;  %s804_s25 = smov 64   ;;  %vm259_vm3 = vcmask 519168   ;;  %s805_s26 = smov 127   ;;  %v316_v21 = vld [vmem:[#allocation2 + $0x10] sm:$0xff]  ;;  %v302_v26 = vld [vmem:[#allocation2 + $0x20] sm:$0xff]  ;;  %v239_v30 = vlaneseq }
  0x1e   : > { %v261_v2 = vld [vmem:[%s860_s24] sm:$0xf]  ;;  %229 = vst [vmem:[#allocation1] ss:$2 sm:$0xff] %v227_v1  ;;  %v277_v5 = vld [vmem:[%s860_s24 + $0x4] sm:$0xf] }
  0x1f   : > { %v263_v3 = vmul.f32 0.2, %v261_v2  ;;  %vm262_vm1 = vcmp.ge.f32.partialorder %v261_v2, 0.0  ;;  %v279_v8 = vmul.f32 0.2, %v277_v5  ;;  %vm278_vm2 = vcmp.ge.f32.partialorder %v277_v5, 0.0 }
  0x20   : > { %v272_v12 = vld [vmem:[%s860_s24 + $0x4] sm:$0xf]  ;;  %v255_v14 = vld [vmem:[%s860_s24] sm:$0xf]  ;;  %s806_s27 = smov 119   ;;  %v288_v20 = vld [vmem:[#allocation2 + $0x30] sm:$0xff] }
  0x21   : > { %v264_v4 = vsel %vm262_vm1, %v261_v2, %v263_v3  ;;  %v280_v9 = vsel %vm278_vm2, %v277_v5, %v279_v8  ;;  %v274_v13 = vmul.f32 0.2, %v272_v12  ;;  %vm273_vm4 = vcmp.ge.f32.partialorder %v272_v12, 0.0  ;;  %s807_s28 = smov 1   ;;  %s808_s29 = smov 7   ;;  %v372_v61 = vld [vmem:[%s1048_s1] sm:$0xff] }
  0x22   : > { %v257_v16 = vmul.f32 0.2, %v255_v14  ;;  %vm256_vm5 = vcmp.ge.f32.partialorder %v255_v14, 0.0  ;;  %s809_s30 = smov 9   ;;  %s810_s6 = smov 121   ;;  %v240_v31 = vand.u32 127, %v239_v30 }
  0x23   : > { %v275_v15 = vsel %vm273_vm4, %v272_v12, %v274_v13  ;;  %s811_s7 = smov 120   ;;  %s812_s8 = smov 8   ;;  %vm324_vm8 = vcmask 7168   ;;  %vm312_vm9 = vcmask 56320   ;;  %vm357_vm10 = vcmask 64512   ;;  %v396_v63 = vld [vmem:[#allocation3] sm:$0xff] }
  0x24   : > { %276 = vst.msk [vmem:[#allocation2 + $0x28] sm:$0xf] %vm259_vm3, %v275_v15  ;;  %v258_v17 = vsel %vm256_vm5, %v255_v14, %v257_v16  ;;  %v245_v32 = vand.u32 7, %v240_v31  ;;  %vm298_vm11 = vcmask 72704   ;;  %vm394_vm12 = vcmask 523264   ;;  %s743_s13 = sshll.u32 %s851_s19, 4 }
  0x25   : > { %v866_v6 = vld.sshfl [vmem:[#allocation1] sm:$0xff pattern:$0x75316420]  ;;  %v868_v7 = vld.sshfl [vmem:[#allocation1 + $0x8] sm:$0xff pattern:$0x75316420]  ;;  %s972_s20 = scalar_lea.vmem %s1052_s5, %s743_s13 }
  0x26   : > { %266 = vst [vmem:[#allocation1] ss:$2 sm:$0xff] %v264_v4  ;;  %vm898_vm6 = vcmp.lt.s32.totalorder %v245_v32, 7  ;;  %vm904_vm7 = vcmp.gt.s32.totalorder %v245_v32, 0  ;;  %vm440_vm13 = vcmask 261120   ;;  %vm467_vm14 = vcmask 523268  }
  0x27   : > { %260 = vst.msk [vmem:[#allocation2 + $0x8] sm:$0xf] %vm259_vm3, %v258_v17  ;;  %v729_v31 = vld [vmem:[%s1049_s2 + $0x8] sm:$0xf]  ;;  %v469_v32 = vld [vmem:[#allocation4] sm:$0xf] }
  0x28   : > { %237 = vst [vmem:[%s972_s20] sm:$0xf] %v866_v6  ;;  %vm506_vm15 = vcmask 1048068   ;;  %p735_p5 = scmp.ne.s32.totalorder %s851_s19, 1 }
  0x29   : > { %238 = vst [vmem:[%s972_s20 + $0x8] sm:$0xf] %v868_v7 }
  0x2b   : > { %v303_v18 = vld [vmem:[#allocation2 + $0x28] sm:$0xff] }
  0x2c   : > { %341 = vrot.lane.b32.xlu2 %v303_v18, %s805_s26  ;;  %v769_v28 = vpack.i.bf16 %v303_v18, %v302_v26 }
  0x2d   : > { %v267_v10 = vld.sshfl [vmem:[#allocation1] sm:$0xff pattern:$0x75316420] }
  0x2e   : > { %268 = vrot.lane.b32.xlu0 %v267_v10, %s804_s25  ;;  %282 = vst [vmem:[#allocation1] ss:$2 sm:$0xff] %v280_v9  ;;  %v877_v19 = vld [vmem:[#allocation2 + $0x8] sm:$0xff] }
  0x2f   : > { %349 = vrot.lane.b32.xlu1 %v877_v19, %s806_s27 }
  0x35   : > { %v283_v11 = vld.sshfl [vmem:[#allocation1] sm:$0xff pattern:$0x75316420] }
  0x36   : > { %284 = vrot.lane.b32.xlu0 %v283_v11, %s804_s25 }
  0x3e   : > { %334 = vrot.lane.b32.xlu0 %v288_v20, %s807_s28 }
  0x46   : > { %320 = vrot.lane.b32.xlu0 %v316_v21, %s807_s28 }
  0x4e   : > { %310 = vrot.lane.b32.xlu0 %v303_v18, %s808_s29 }
  0x56   : > { %294 = vrot.lane.b32.xlu0 %v288_v20, %s809_s30 }
  0x86   : > { %v342_v35 = vpop.permute.xlu2 %341 }
  0xa0   : > { %v269_v22 = vpop.permute.xlu0 %268 }
  0xa1   : > { %271 = vst.msk [vmem:[#allocation2 + $0x18] sm:$0xf] %vm259_vm3, %v269_v22  ;;  %v350_v34 = vpop.permute.xlu1 %349 }
  0xa2   : > { %714 = vmatpush.msk.msra.mxu0 %vm898_vm6, %v350_v34  ;;  %v472_v34 = vld [vmem:[#allocation5] sm:$0xf] }
  0xa8   : > { %v317_v23 = vld [vmem:[#allocation2 + $0x18] sm:$0xff]  ;;  %v285_v24 = vpop.permute.xlu0 %284 }
  0xa9   : > { %345 = vrot.lane.b32.xlu2 %v317_v23, %s810_s6  ;;  %v764_v25 = vpack.i.bf16 %v877_v19, %v317_v23  ;;  %287 = vst.msk [vmem:[#allocation2 + $0x38] sm:$0xf] %vm259_vm3, %v285_v24  ;;  %v725_v24 = vld [vmem:[%s1049_s2 + $0x4] sm:$0xf] }
  0xab   : > { %765 = vrot.lane.b32.xlu1 %v764_v25, %s811_s7 }
  0xb0   : > { %v289_v27 = vld [vmem:[#allocation2 + $0x38] sm:$0xff]  ;;  %v335_v41 = vpop.permute.xlu0 %334 }
  0xb1   : > { %330 = vrot.lane.b32.xlu2 %v877_v19, %s805_s26  ;;  %v774_v29 = vpack.i.bf16 %v289_v27, %v288_v20 }
  0xb3   : > { %322 = vrot.lane.b32.xlu1 %v317_v23, %s807_s28 }
  0xb8   : > { %v321_v45 = vpop.permute.xlu0 %320 }
  0xb9   : > { %308 = vrot.lane.b32.xlu2 %v302_v26, %s808_s29 }
  0xbb   : > { %336 = vrot.lane.b32.xlu1 %v289_v27, %s807_s28 }
  0xc0   : > { %v311_v49 = vpop.permute.xlu0 %310 }
  0xc1   : > { %770 = vrot.lane.b32.xlu2 %v769_v28, %s812_s8 }
  0xc3   : > { %775 = vrot.lane.b32.xlu1 %v774_v29, %s812_s8 }
  0xc8   : > { %v295_v59 = vpop.permute.xlu0 %294 }
  0xc9   : > { %414 = vrot.lane.b32.xlu2 %v396_v63, %s807_s28 }
  0xcb   : > { %296 = vrot.lane.b32.xlu1 %v289_v27, %s809_s30 }
 0x103   : > { %v346_v36 = vpop.permute.xlu2 %345 }
 0x10b   : > { %v331_v39 = vpop.permute.xlu2 %330 }
 0x113   : > { %v309_v44 = vpop.permute.xlu2 %308 }
 0x114   : > { %v313_v56 = vsel %vm312_vm9, %v309_v44, %v311_v49 }
 0x11b   : > { %v771_v48 = vpop.permute.xlu2 %770 }
 0x11c   : > { %v773_v51 = vunpack.i.h.bf16 %v771_v48  ;;  %v772_v55 = vunpack.i.l.bf16 %v771_v48 }
 0x11d   : > { %v766_v37 = vpop.permute.xlu1 %765 }
 0x11e   : > { %v767_v38 = vunpack.i.l.bf16 %v766_v37  ;;  %v768_v40 = vunpack.i.h.bf16 %v766_v37  ;;  %v358_v58 = vsel %vm357_vm10, %v772_v55, %v773_v51 }
 0x120   : > { %374 = vmatpush.msra.mxu0 %v767_v38 }
 0x122   : > { %375 = vmatpush.msra.mxu0 %v768_v40 }
 0x123   : > { %v415_v3 = vpop.permute.xlu2 %414 }
 0x124   : > { %715 = vmatpush.msk.msra.mxu0 %vm904_vm7, %v346_v36 }
 0x125   : > { %v323_v43 = vpop.permute.xlu1 %322 }
 0x126   : > { %716 = vmatpush.msk.msra.mxu0 %vm898_vm6, %v342_v35  ;;  %v325_v54 = vsel %vm324_vm8, %v321_v45, %v323_v43 }
 0x128   : > { %378 = vmatpush.msra.mxu0 %v289_v27  ;;  %v731_v27 = vld [vmem:[%s1049_s2 + $0xc] sm:$0xf] }
 0x12a   : > { %379 = vmatpush.msra.mxu0 %v303_v18 }
 0x12d   : > { %v337_v46 = vpop.permute.xlu1 %336 }
 0x12e   : > { %v338_v47 = vsel %vm324_vm8, %v335_v41, %v337_v46 }
 0x12f   : > { %717 = vmatpush.msk.msra.mxu0 %vm904_vm7, %v338_v47 }
 0x131   : > { %718 = vmatpush.msk.msra.mxu0 %vm898_vm6, %v331_v39 }
 0x133   : > { %382 = vmatpush.msra.mxu0 %v317_v23  ;;  %v439_v23 = vld [vmem:[%s1049_s2] sm:$0xf] }
 0x135   : > { %v776_v50 = vpop.permute.xlu1 %775  ;;  %383 = vmatpush.msra.mxu0 %v877_v19 }
 0x136   : > { %v778_v52 = vunpack.i.h.bf16 %v776_v50  ;;  %v777_v53 = vunpack.i.l.bf16 %v776_v50 }
 0x137   : > { %719 = vmatpush.msk.msra.mxu0 %vm904_vm7, %v325_v54 }
 0x138   : > { %v364_v57 = vsel %vm357_vm10, %v777_v53, %v778_v52 }
 0x139   : > { %720 = vmatpush.msk.msra.mxu0 %vm898_vm6, %v313_v56 }
 0x13b   : > { %386 = vmatpush.msra.mxu0 %v364_v57 }
 0x13d   : > { %v297_v60 = vpop.permute.xlu1 %296  ;;  %387 = vmatpush.msra.mxu0 %v358_v58 }
 0x13e   : > { %v299_v62 = vsel %vm298_vm11, %v295_v59, %v297_v60 }
 0x13f   : > { %721 = vmatpush.msk.msra.mxu0 %vm904_vm7, %v299_v62 }
 0x140   : > { %389 = vmatmul.f32.vlgmr.msra.gmra.mxu0 %v372_v61 }
 0x1bd   : > { %v390_v0 = vpop.f32.mrf.mxu0 }
 0x1be   : > { %v393_v1 = vmax.f32 %v390_v0, 0.0 }
 0x1c0   : > { %395 = vst.msk [vmem:[#allocation3 + $0x8] sm:$0xff] %vm394_vm12, %v393_v1 }
 0x1c7   : > { %v397_v2 = vld [vmem:[#allocation3 + $0x8] sm:$0xff] }
 0x1c8   : > { %425 = vrot.lane.b32.xlu1 %v397_v2, %s810_s6  ;;  %416 = vrot.lane.b32.xlu0 %v397_v2, %s807_s28 }
 0x1d0   : > { %400 = vrot.lane.b32.xlu1 %v396_v63, %s809_s30 }
 0x1d8   : > { %407 = vrot.lane.b32.xlu1 %v396_v63, %s808_s29 }
 0x1e0   : > { %523 = vrot.lane.b32.xlu1 %v397_v2, %s811_s7 }
 0x23a   : > { %v426_v4 = vpop.permute.xlu1 %425  ;;  %v417_v5 = vpop.permute.xlu0 %416 }
 0x23b   : > { %v428_v8 = vsel %vm904_vm7, %v426_v4, 0.0  ;;  %v418_v9 = vsel %vm324_vm8, %v415_v3, %v417_v5 }
 0x23c   : > { %v420_v10 = vsel %vm904_vm7, %v418_v9, 0.0  ;;  %516 = vrot.lane.b32.xlu0 %v428_v8, %s812_s8 }
 0x23d   : > { %v779_v11 = vpack.i.bf16 %v397_v2, %v420_v10 }
 0x23f   : > { %780 = vrot.lane.b32.xlu2 %v779_v11, %s812_s8 }
 0x242   : > { %v401_v14 = vpop.permute.xlu1 %400 }
 0x244   : > { %433 = vrot.lane.b32.xlu0 %v396_v63, %s812_s8 }
 0x247   : > { %402 = vrot.lane.b32.xlu2 %v397_v2, %s809_s30 }
 0x24a   : > { %v408_v20 = vpop.permute.xlu1 %407 }
 0x24c   : > { %421 = vrot.lane.b32.xlu0 %v397_v2, %s805_s26 }
 0x24f   : > { %409 = vrot.lane.b32.xlu2 %v397_v2, %s808_s29 }
 0x252   : > { %v524_v26 = vpop.permute.xlu1 %523 }
 0x257   : > { %429 = vrot.lane.b32.xlu2 %v397_v2, %s806_s27 }
 0x299   : > { %v781_v12 = vpop.permute.xlu2 %780 }
 0x29a   : > { %v783_v13 = vunpack.i.h.bf16 %v781_v12  ;;  %785 = vrot.lane.b32.xlu0 %v781_v12, %s811_s7 }
 0x2a1   : > { %v403_v15 = vpop.permute.xlu2 %402 }
 0x2a2   : > { %v404_v16 = vsel %vm298_vm11, %v401_v14, %v403_v15 }
 0x2a3   : > { %722 = vmatpush.msk.msra.mxu1 %vm904_vm7, %v404_v16 }
 0x2a9   : > { %v410_v18 = vpop.permute.xlu2 %409 }
 0x2aa   : > { %v411_v22 = vsel %vm312_vm9, %v408_v20, %v410_v18 }
 0x2ae   : > { %v517_v17 = vpop.permute.xlu0 %516 }
 0x2af   : > { %525 = vrot.lane.b32.xlu1 %v517_v17, %s811_s7 }
 0x2b1   : > { %v430_v28 = vpop.permute.xlu2 %429 }
 0x2b6   : > { %v434_v19 = vpop.permute.xlu0 %433 }
 0x2b7   : > { %v437_v21 = vsel %vm357_vm10, %v434_v19, %v783_v13 }
 0x2b8   : > { %457 = vmatpush.msra.mxu1 %v437_v21  ;;  %493 = vmatpush.msra.mxu2 %v437_v21 }
 0x2ba   : > { %723 = vmatpush.msk.msra.mxu1 %vm904_vm7, %v418_v9  ;;  %726 = vmatpush.msk.msra.mxu2 %vm898_vm6, %v411_v22 }
 0x2bc   : > { %459 = vmatpush.msra.mxu1 %v397_v2  ;;  %495 = vmatpush.msra.mxu2 %v397_v2 }
 0x2bd   : > { %724 = vmatmul.msk.f32.vlgmr.msra.gmra.mxu1 %vm440_vm13, %v439_v23 }
 0x2be   : > { %586 = vmatpush.msrb.mxu1 %v397_v2  ;;  %v422_v25 = vpop.permute.xlu0 %421 }
 0x2bf   : > { %727 = vmatpush.msk.msra.mxu2 %vm898_vm6, %v422_v25 }
 0x2c0   : > { %732 = vmatpush.msk.msrb.mxu1 %vm898_vm6, %v422_v25  ;;  %728 = vmatmul.msk.f32.vlgmr.msra.gmra.mxu2 %vm440_vm13, %v725_v24 }
 0x2c2   : > { %588 = vmatpush.msrb.mxu1 %v524_v26 }
 0x2c4   : > { %733 = vmatpush.msk.msrb.mxu1 %vm898_vm6, %v430_v28 }
 0x2c5   : > { %734 = vmatmul.msk.f32.vlgmr.msrb.gmra.mxu1 %vm440_vm13, %v731_v27 }
 0x30c   : > { %v786_v6 = vpop.permute.xlu0 %785 }
 0x30d   : > { %v787_v29 = vunpack.i.l.bf16 %v786_v6  ;;  %v788_v7 = vunpack.i.h.bf16 %v786_v6 }
 0x30f   : > { %550 = vmatpush.msra.mxu3 %v787_v29 }
 0x311   : > { %551 = vmatpush.msra.mxu3 %v788_v7 }
 0x321   : > { %v526_v30 = vpop.permute.xlu1 %525 }
 0x322   : > { %552 = vmatpush.msra.mxu3 %v526_v30 }
 0x324   : > { %553 = vmatpush.msra.mxu3 %v524_v26 }
 0x325   : > { %730 = vmatmul.msk.f32.vlgmr.msra.gmra.mxu3 %vm440_vm13, %v729_v31 }
 0x33a   : > { %v461_v33 = vpop.f32.mrf.mxu1 }
 0x33b   : > { %v465_v35 = vrot.slane %v461_v33, 4  ;;  %v470_v36 = vadd.f32 %v469_v32, %v461_v33  ;;  %v473_v37 = vmul.f32 %v461_v33, %v461_v33 }
 0x33d   : > { %471 = vst.msk [vmem:[#allocation4] sm:$0xf] %vm259_vm3, %v470_v36  ;;  %v474_v38 = vadd.f32 %v473_v37, %v472_v34 }
 0x33e   : > { %468 = vst.msk [vmem:[%s972_s20] sm:$0xf0] %vm467_vm14, %v465_v35 }
 0x33f   : > { %475 = vst.msk [vmem:[#allocation5] sm:$0xf] %vm259_vm3, %v474_v38 }
 0x342   : > { %v591_v39 = vpop.f32.mrf.mxu1 }
 0x343   : > { %v595_v40 = vrot.slane %v591_v39, 4  ;;  %v498_v41 = vpop.f32.mrf.mxu2  ;;  %v604_v56 = vmul.f32 %v591_v39, %v591_v39 }
 0x344   : > { %v502_v42 = vrot.slane %v498_v41, 4  ;;  %v508_v43 = vld [vmem:[#allocation4] sm:$0xf]  ;;  %v512_v44 = vmul.f32 %v498_v41, %v498_v41 }
 0x345   : > { %v509_v45 = vadd.f32 %v508_v43, %v498_v41  ;;  %596 = vrot.lane.b32.xlu0 %v595_v40, %s804_s25 }
 0x346   : > { %v511_v46 = vld [vmem:[#allocation5] sm:$0xf]  ;;  %503 = vrot.lane.b32.xlu2 %v502_v42, %s804_s25 }
 0x347   : > { %510 = vst.msk [vmem:[#allocation4] sm:$0xf] %vm259_vm3, %v509_v45  ;;  %v513_v47 = vadd.f32 %v512_v44, %v511_v46 }
 0x349   : > { %514 = vst.msk [vmem:[#allocation5] sm:$0xf] %vm259_vm3, %v513_v47 }
 0x34e   : > { %v562_v50 = vld [vmem:[#allocation4] sm:$0xf] }
 0x350   : > { %v565_v54 = vld [vmem:[#allocation5] sm:$0xf] }
 0x3a0   : > { %v504_v48 = vpop.permute.xlu2 %503 }
 0x3a1   : > { %507 = vst.msk [vmem:[%s972_s20] sm:$0xf0] %vm506_vm15, %v504_v48 }
 0x3a8   : > { %v555_v49 = vpop.f32.mrf.mxu3 }
 0x3a9   : > { %v559_v51 = vrot.slane %v555_v49, 4  ;;  %v563_v52 = vadd.f32 %v562_v50, %v555_v49  ;;  %v566_v53 = vmul.f32 %v555_v49, %v555_v49 }
 0x3ab   : > { %561 = vst.msk [vmem:[%s972_s20 + $0x8] sm:$0xf0] %vm467_vm14, %v559_v51  ;;  %v567_v55 = vadd.f32 %v566_v53, %v565_v54 }
 0x3ac   : > { %564 = vst.msk [vmem:[#allocation4] sm:$0xf] %vm259_vm3, %v563_v52 }
 0x3ad   : > { %568 = vst.msk [vmem:[#allocation5] sm:$0xf] %vm259_vm3, %v567_v55 }
 0x3b3   : > { %v600_v57 = vld [vmem:[#allocation4] sm:$0xf] }
 0x3b4   : > { %v601_v58 = vadd.f32 %v600_v57, %v591_v39  ;;  %v603_v59 = vld [vmem:[#allocation5] sm:$0xf]  ;;  %610 = sbr.rel (%p735_p5) target bundleno = 1240 (0x4d8), region = 48 }
 0x3b5   : > { %v605_v60 = vadd.f32 %v604_v56, %v603_v59 }
 0x3b6   : > { %602 = vst.msk [vmem:[#allocation4] sm:$0xf] %vm259_vm3, %v601_v58 }
 0x3b7   : > { %606 = vst.msk [vmem:[#allocation5] sm:$0xf] %vm259_vm3, %v605_v60  ;;  %v597_v61 = vpop.permute.xlu0 %596 }
 0x3b8   : > { %599 = vst.msk [vmem:[%s972_s20 + $0x8] sm:$0xf0] %vm506_vm15, %v597_v61 }
 0x3b9   : > { %v813_v2 = vmov 512.0   ;;  %v814_v8 = vmov 0   ;;  %v630_v24 = vld [vmem:[%s1050_s3] sm:$0xf] }
 0x3ba   : > { %791 = vrcp.f32 %v813_v2  ;;  %789 = vset.pattern.permute.xlu1 %v814_v8  ;;  %790 = vset.pattern.permute.xlu0 %v814_v8  ;;  %v643_v6 = vld [vmem:[%s1051_s4] sm:$0xf] }
 0x3bd   : > { %v611_v62 = vld [vmem:[#allocation4] sm:$0xf] }
 0x3be   : > { %v612_v63 = vsel %vm259_vm3, %v611_v62, 0.0  ;;  %v615_v0 = vld [vmem:[#allocation5] sm:$0xf] }
 0x3bf   : > { %613 = vadd.xlane.f32.xlu0 %v612_v63  ;;  %v616_v1 = vsel %vm259_vm3, %v615_v0, 0.0  ;;  %v646_v31 = vld [vmem:[%s1052_s5] sm:$0xf0]  ;;  %v647_v32 = vld [vmem:[%s1052_s5 + $0x8] sm:$0xf0] }
 0x3c0   : > { %v792_v3 = vpop.eup %791  ;;  %v736_v33 = vld [vmem:[%s1052_s5 + $0x10] sm:$0xf0]  ;;  %v737_v34 = vld [vmem:[%s1052_s5 + $0x18] sm:$0xf0] }
 0x3c1   : > { %v620_v4 = vmul.f32 512.0, %v792_v3  ;;  %vm624_vm0 = vweird.f32 %v792_v3 }
 0x3c3   : > { %v621_v5 = vsub.f32 1.0, %v620_v4 }
 0x3c5   : > { %v622_v9 = vmul.f32 %v792_v3, %v621_v5 }
 0x3c7   : > { %617 = vadd.xlane.f32.xlu0 %v616_v1  ;;  %v623_v10 = vadd.f32 %v792_v3, %v622_v9 }
 0x3c9   : > { %v625_v12 = vsel %vm624_vm0, %v792_v3, %v623_v10 }
 0x432   : > { %v614_v11 = vpop.xlane.xlu0 %613 }
 0x433   : > { %v626_v13 = vmul.f32 %v625_v12, %v614_v11 }
 0x435   : > { %v628_v15 = vmul.f32 %v626_v13, %v626_v13 }
 0x43a   : > { %v618_v14 = vpop.xlane.xlu0 %617 }
 0x43b   : > { %v627_v16 = vmul.f32 %v625_v12, %v618_v14 }
 0x43d   : > { %v629_v17 = vsub.f32 %v627_v16, %v628_v15 }
 0x43f   : > { %v631_v18 = vadd.f32 1e-05, %v629_v17 }
 0x441   : > { %793 = vrsqrt.f32 %v631_v18  ;;  %vm638_vm2 = vweird.f32 %v631_v18 }
 0x447   : > { %v794_v19 = vpop.eup %793 }
 0x448   : > { %v633_v20 = vmul.f32 %v794_v19, %v631_v18  ;;  %vm639_vm1 = vweird.f32 %v794_v19 }
 0x449   : > { %vm640_vm3 = vmor %vm638_vm2, %vm639_vm1 }
 0x44a   : > { %v634_v21 = vmul.f32 %v794_v19, %v633_v20 }
 0x44c   : > { %v635_v22 = vmul.f32 0.5, %v634_v21 }
 0x44e   : > { %v636_v23 = vsub.f32 1.5, %v635_v22 }
 0x450   : > { %v637_v25 = vmul.f32 %v794_v19, %v636_v23 }
 0x452   : > { %v641_v26 = vsel %vm640_vm3, %v794_v19, %v637_v25 }
 0x453   : > { %v642_v27 = vmul.f32 %v641_v26, %v630_v24 }
 0x455   : > { %650 = vperm.xlu1 %789, %v642_v27   ;;  %v644_v28 = vmul.f32 %v642_v27, %v626_v13 }
 0x457   : > { %v645_v29 = vsub.f32 %v643_v6, %v644_v28 }
 0x45d   : > { %658 = vperm.xlu1 %789, %v645_v29  }
 0x4c7   : > { %v651_v7 = vpop.permute.xlu1 %650 }
 0x4c8   : > { %v652_v30 = vrot.slane %v651_v7, 4 }
 0x4ca   : > { %v654_v36 = vmul.f32 %v652_v30, %v646_v31  ;;  %v655_v37 = vmul.f32 %v652_v30, %v647_v32  ;;  %v669_v38 = vmul.f32 %v736_v33, %v652_v30  ;;  %v670_v40 = vmul.f32 %v737_v34, %v652_v30 }
 0x4cf   : > { %v659_v35 = vpop.permute.xlu1 %658 }
 0x4d0   : > { %v660_v39 = vrot.slane %v659_v35, 4 }
 0x4d2   : > { %v662_v41 = vadd.f32 %v660_v39, %v654_v36  ;;  %v663_v42 = vadd.f32 %v660_v39, %v655_v37  ;;  %v671_v43 = vadd.f32 %v669_v38, %v660_v39  ;;  %v672_v44 = vadd.f32 %v670_v40, %v660_v39 }
 0x4d4   : > { %664 = vst [vmem:[%s1052_s5] sm:$0xf0] %v662_v41 }
 0x4d5   : > { %665 = vst [vmem:[%s1052_s5 + $0x8] sm:$0xf0] %v663_v42 }
 0x4d6   : > { %738 = vst [vmem:[%s1052_s5 + $0x10] sm:$0xf0] %v671_v43 }
 0x4d7   : > { %739 = vst [vmem:[%s1052_s5 + $0x18] sm:$0xf0] %v672_v44 }
 0x4d8 PF: > { %s15_s18 = sadd.s32 1, %s801_s18  }
 0x4d9   : > { %p12_p6 = scmp.ge.s32.totalorder %s15_s18, 4  }
 0x4db   :  { %14 = sbr.rel (!%p12_p6) target bundleno = 1 (0x1), region = 79 }

</bundles_post_ra>
